<compile_context>
chip_gen: v5e
topology: v5e:2x2
jax: 0.10.0
libtpu: 0.0.40
codegen_flags: <defaults>
</compile_context>

<pallas_src>
import functools
import math

import jax
import jax.numpy as jnp
from jax.experimental import pallas as pl
from jax.experimental.pallas import tpu as pltpu


def _conv1d_kernel(x_ref, w_ref, *rest, stride: int, dilation: int,
                   padding: int, has_bias: bool):
    """x_ref: (Bb, C_in, L)        w_ref: (C_out, K*C_in)
       [b_ref: (C_out, 1)]         o_ref: (Bb, C_out, L_out)
       xpad_ref: (C_in, Bb*Lp)     col_ref: (K*C_in, Bb*L_out)   (VMEM scratch)
    """
    if has_bias:
        b_ref, o_ref, xpad_ref, col_ref = rest
    else:
        b_ref = None
        o_ref, xpad_ref, col_ref = rest

    Bb, C_in, L = x_ref.shape
    C_out, L_out = o_ref.shape[1], o_ref.shape[2]
    K = w_ref.shape[1] // C_in
    Lp = L + 2 * padding

    # --- Fused zero padding: stage x into a per-batch segmented, lane-major
    # padded buffer entirely in VMEM. No extra HBM read/write pass. ---
    if padding > 0:
        xpad_ref[...] = jnp.zeros_like(xpad_ref)
    for b in range(Bb):                       # Bb is a small static constant
        lo = b * Lp + padding
        xpad_ref[:, lo:lo + L] = x_ref[b]

    # --- im2col-on-the-fly:
    #   col[k*C_in + ci, b*L_out + i] = xpad[ci, b*Lp + k*dil + i*stride]
    # Folding K into the contraction gives one deep matmul (depth K*C_in)
    # instead of K shallow ones; stride handled by strided ref reads. ---
    for k in range(K):
        for b in range(Bb):
            off = b * Lp + k * dilation
            if stride == 1:
                src = xpad_ref[:, off:off + L_out]
            else:
                src = xpad_ref[:, pl.ds(off, L_out, stride=stride)]
            col_ref[k * C_in:(k + 1) * C_in, b * L_out:(b + 1) * L_out] = src

    # --- One lane-dense MXU matmul over all batches in the block, f32 acc,
    # bias added once after accumulation. ---
    acc = jnp.dot(w_ref[...], col_ref[...], preferred_element_type=jnp.float32)
    if has_bias:
        acc = acc + b_ref[...]                # (C_out, 1) broadcast, once
    for b in range(Bb):
        o_ref[b] = acc[:, b * L_out:(b + 1) * L_out].astype(o_ref.dtype)


def prepare_conv1d_params(weight: jax.Array, bias: jax.Array | None):
    """One-time relayout (module init time, outside the hot path).

    weight: (C_out, C_in, K) -> (C_out, K*C_in) with index [o, k*C_in + ci].
    bias:   (C_out,)         -> (C_out, 1) or None.
    """
    C_out, C_in, K = weight.shape
    w_mat = jnp.transpose(weight, (0, 2, 1)).reshape(C_out, K * C_in)
    b2d = None if bias is None else bias.reshape(C_out, 1)
    return w_mat, b2d


def _choose_batch_block(B, C_in, C_out, L, Lp, L_out, K, itemsize,
                        vmem_budget_bytes=8 * 1024 * 1024, max_unroll=8):
    """Largest batch block that fits a conservative VMEM budget (and keeps the
    in-kernel static unroll bounded)."""
    def vmem_bytes(bb):
        x_blk = bb * C_in * L * itemsize
        o_blk = bb * C_out * L_out * itemsize
        xpad = C_in * bb * Lp * itemsize
        col = K * C_in * bb * L_out * itemsize
        w = C_out * K * C_in * itemsize
        acc = C_out * bb * L_out * 4
        return 2 * (x_blk + o_blk) + xpad + col + w + acc   # 2x = double buffer
    bb = max(1, min(B, max_unroll))
    while bb > 1 and vmem_bytes(bb) > vmem_budget_bytes:
        bb -= 1
    return bb


def conv1d_forward(signal: jax.Array,
                   w_mat: jax.Array,
                   bias2d: jax.Array | None,
                   *,
                   kernel_size: int,
                   stride: int = 1,
                   padding: int | None = None,
                   dilation: int = 1) -> jax.Array:
    """nn.Conv1d forward. signal: (B, C_in, L); w_mat/bias2d from
    `prepare_conv1d_params`. `padding=None` reproduces the module's 'same'
    padding for odd kernel sizes."""
    B, C_in, L = signal.shape
    K = kernel_size
    C_out = w_mat.shape[0]
    assert w_mat.shape == (C_out, K * C_in), "weight layout mismatch"

    if padding is None:
        assert K % 2 == 1, "same-padding path requires odd kernel_size"
        padding = dilation * (K - 1) // 2

    Lp = L + 2 * padding
    L_out = (Lp - dilation * (K - 1) - 1) // stride + 1
    assert L_out > 0, "output length must be positive"

    itemsize = jnp.dtype(signal.dtype).itemsize
    Bb = _choose_batch_block(B, C_in, C_out, L, Lp, L_out, K, itemsize)
    num_blocks = pl.cdiv(B, Bb)

    has_bias = bias2d is not None
    kernel = functools.partial(_conv1d_kernel, stride=stride,
                               dilation=dilation, padding=padding,
                               has_bias=has_bias)

    in_specs = [
        pl.BlockSpec((Bb, C_in, L), lambda i: (i, 0, 0)),          # x (per block)
        pl.BlockSpec((C_out, K * C_in), lambda i: (0, 0)),         # weights (replicated)
    ]
    args = [signal, w_mat]
    if has_bias:
        in_specs.append(pl.BlockSpec((C_out, 1), lambda i: (0, 0)))
        args.append(bias2d)

    return pl.pallas_call(
        kernel,
        out_shape=jax.ShapeDtypeStruct((B, C_out, L_out), signal.dtype),
        grid=(num_blocks,),
        in_specs=in_specs,
        out_specs=pl.BlockSpec((Bb, C_out, L_out), lambda i: (i, 0, 0)),
        scratch_shapes=[
            pltpu.VMEM((C_in, Bb * Lp), signal.dtype),        # fused zero-pad buffer
            pltpu.VMEM((K * C_in, Bb * L_out), signal.dtype), # im2col buffer
        ],
        compiler_params=pltpu.CompilerParams(
            dimension_semantics=("parallel",)),
    )(*args)


if __name__ == "__main__":
    key = jax.random.PRNGKey(0)
    kx, kw, kb = jax.random.split(key, 3)

    # Small shapes consistent with the module: (batch, channels, length).
    B, C_in, C_out, L, K = 2, 4, 8, 16, 3

    x = jax.random.normal(kx, (B, C_in, L), dtype=jnp.float32)

    # Xavier-uniform weight (gain('linear') == 1), PyTorch-style bias init.
    fan_in, fan_out = C_in * K, C_out * K
    w_bound = math.sqrt(6.0 / (fan_in + fan_out))
    weight = jax.random.uniform(kw, (C_out, C_in, K), jnp.float32, -w_bound, w_bound)
    b_bound = 1.0 / math.sqrt(fan_in)
    bias = jax.random.uniform(kb, (C_out,), jnp.float32, -b_bound, b_bound)

    def ref_conv(x, w, b, stride, pad, dil):
        y = jax.lax.conv_general_dilated(
            x, w, window_strides=(stride,), padding=[(pad, pad)],
            rhs_dilation=(dil,), dimension_numbers=("NCH", "OIH", "NCH"))
        if b is not None:
            y = y + b[None, :, None]
        return y

    # --- (a) kernel_size=3, 'same' padding, stride=1, dilation=1, bias ---
    w_mat, b2d = prepare_conv1d_params(weight, bias)
    y = jax.block_until_ready(
        conv1d_forward(x, w_mat, b2d, kernel_size=K))
    y_ref = ref_conv(x, weight, bias, 1, 1, 1)
    assert y.shape == y_ref.shape and y.dtype == x.dtype
    assert jnp.allclose(y, y_ref, rtol=1e-4, atol=1e-4)

    # --- (b) module defaults: kernel_size=1 (padding -> 0), bias ---
    w1 = jax.random.uniform(kw, (C_out, C_in, 1), jnp.float32, -0.5, 0.5)
    w1_mat, b1_2d = prepare_conv1d_params(w1, bias)
    y1 = jax.block_until_ready(
        conv1d_forward(x, w1_mat, b1_2d, kernel_size=1))
    y1_ref = ref_conv(x, w1, bias, 1, 0, 1)
    assert jnp.allclose(y1, y1_ref, rtol=1e-4, atol=1e-4)

    # --- (c) stride=2, dilation=2, no bias (in-kernel stride + dilation) ---
    w_mat2, _ = prepare_conv1d_params(weight, None)
    y2 = jax.block_until_ready(
        conv1d_forward(x, w_mat2, None, kernel_size=K, stride=2, dilation=2))
    y2_ref = ref_conv(x, weight, None, 2, 2, 2)
    assert y2.shape == y2_ref.shape
    assert jnp.allclose(y2, y2_ref, rtol=1e-4, atol=1e-4)

    print("KERNEL_OK")
</pallas_src>

<mosaic_0001>
module attributes {stable_mosaic.version = 11 : i64} {
  func.func @_conv1d_kernel(%arg0: i32, %arg1: memref<2x4x16xf32, #tpu.memory_space<vmem>>, %arg2: memref<8x12xf32, #tpu.memory_space<vmem>>, %arg3: memref<8x1xf32, #tpu.memory_space<vmem>>, %arg4: memref<2x8x16xf32, #tpu.memory_space<vmem>>, %arg5: memref<4x36xf32, #tpu.memory_space<vmem>>, %arg6: memref<12x32xf32, #tpu.memory_space<vmem>>) attributes {dimension_semantics = [#tpu.dimension_semantics<parallel>], iteration_bounds = array<i64: 1>, scalar_prefetch = 0 : i64, scratch_operands = 2 : i64, tpu.core_type = #tpu.core_type<tc>, window_params = [{transform_indices = @transform_0, window_bounds = array<i64: 2, 4, 16>}, {pipeline_mode = #tpu.pipeline_mode<synchronous>, transform_indices = @transform_1, window_bounds = array<i64: 8, 12>}, {pipeline_mode = #tpu.pipeline_mode<synchronous>, transform_indices = @transform_2, window_bounds = array<i64: 8, 1>}, {transform_indices = @transform_3, window_bounds = array<i64: 2, 8, 16>}]} {
    %cst = arith.constant 0.000000e+00 : f32
    %0 = vector.broadcast %cst : f32 to vector<4x36xf32>
    %c0 = arith.constant 0 : index
    %c0_0 = arith.constant 0 : index
    %1 = vector.load %arg5[%c0, %c0_0] : memref<4x36xf32, #tpu.memory_space<vmem>>, vector<4x36xf32>
    tpu.vector_store %arg5[%c0, %c0_0], %0 {strides = array<i32>} : memref<4x36xf32, #tpu.memory_space<vmem>>, vector<4x36xf32>,
    %c0_1 = arith.constant 0 : index
    %c0_2 = arith.constant 0 : index
    %c0_3 = arith.constant 0 : index
    %2 = vector.load %arg1[%c0_1, %c0_2, %c0_3] : memref<2x4x16xf32, #tpu.memory_space<vmem>>, vector<1x4x16xf32>
    %3 = vector.shape_cast %2 : vector<1x4x16xf32> to vector<4x16xf32>
    %c0_4 = arith.constant 0 : index
    %c1 = arith.constant 1 : index
    %4 = vector.load %arg5[%c0_4, %c1] : memref<4x36xf32, #tpu.memory_space<vmem>>, vector<4x16xf32>
    tpu.vector_store %arg5[%c0_4, %c1], %3 {strides = array<i32>} : memref<4x36xf32, #tpu.memory_space<vmem>>, vector<4x16xf32>,
    %c1_5 = arith.constant 1 : index
    %c0_6 = arith.constant 0 : index
    %c0_7 = arith.constant 0 : index
    %5 = vector.load %arg1[%c1_5, %c0_6, %c0_7] : memref<2x4x16xf32, #tpu.memory_space<vmem>>, vector<1x4x16xf32>
    %6 = vector.shape_cast %5 : vector<1x4x16xf32> to vector<4x16xf32>
    %c0_8 = arith.constant 0 : index
    %c19 = arith.constant 19 : index
    %7 = vector.load %arg5[%c0_8, %c19] : memref<4x36xf32, #tpu.memory_space<vmem>>, vector<4x16xf32>
    tpu.vector_store %arg5[%c0_8, %c19], %6 {strides = array<i32>} : memref<4x36xf32, #tpu.memory_space<vmem>>, vector<4x16xf32>,
    %c0_9 = arith.constant 0 : index
    %c0_10 = arith.constant 0 : index
    %8 = vector.load %arg5[%c0_9, %c0_10] : memref<4x36xf32, #tpu.memory_space<vmem>>, vector<4x16xf32>
    %c0_11 = arith.constant 0 : index
    %c0_12 = arith.constant 0 : index
    %9 = vector.load %arg6[%c0_11, %c0_12] : memref<12x32xf32, #tpu.memory_space<vmem>>, vector<4x16xf32>
    tpu.vector_store %arg6[%c0_11, %c0_12], %8 {strides = array<i32>} : memref<12x32xf32, #tpu.memory_space<vmem>>, vector<4x16xf32>,
    %c0_13 = arith.constant 0 : index
    %c18 = arith.constant 18 : index
    %10 = vector.load %arg5[%c0_13, %c18] : memref<4x36xf32, #tpu.memory_space<vmem>>, vector<4x16xf32>
    %c0_14 = arith.constant 0 : index
    %c16 = arith.constant 16 : index
    %11 = vector.load %arg6[%c0_14, %c16] : memref<12x32xf32, #tpu.memory_space<vmem>>, vector<4x16xf32>
    tpu.vector_store %arg6[%c0_14, %c16], %10 {strides = array<i32>} : memref<12x32xf32, #tpu.memory_space<vmem>>, vector<4x16xf32>,
    %c0_15 = arith.constant 0 : index
    %c1_16 = arith.constant 1 : index
    %12 = vector.load %arg5[%c0_15, %c1_16] : memref<4x36xf32, #tpu.memory_space<vmem>>, vector<4x16xf32>
    %c4 = arith.constant 4 : index
    %c0_17 = arith.constant 0 : index
    %13 = vector.load %arg6[%c4, %c0_17] : memref<12x32xf32, #tpu.memory_space<vmem>>, vector<4x16xf32>
    tpu.vector_store %arg6[%c4, %c0_17], %12 {strides = array<i32>} : memref<12x32xf32, #tpu.memory_space<vmem>>, vector<4x16xf32>,
    %c0_18 = arith.constant 0 : index
    %c19_19 = arith.constant 19 : index
    %14 = vector.load %arg5[%c0_18, %c19_19] : memref<4x36xf32, #tpu.memory_space<vmem>>, vector<4x16xf32>
    %c4_20 = arith.constant 4 : index
    %c16_21 = arith.constant 16 : index
    %15 = vector.load %arg6[%c4_20, %c16_21] : memref<12x32xf32, #tpu.memory_space<vmem>>, vector<4x16xf32>
    tpu.vector_store %arg6[%c4_20, %c16_21], %14 {strides = array<i32>} : memref<12x32xf32, #tpu.memory_space<vmem>>, vector<4x16xf32>,
    %c0_22 = arith.constant 0 : index
    %c2 = arith.constant 2 : index
    %16 = vector.load %arg5[%c0_22, %c2] : memref<4x36xf32, #tpu.memory_space<vmem>>, vector<4x16xf32>
    %c8 = arith.constant 8 : index
    %c0_23 = arith.constant 0 : index
    %17 = vector.load %arg6[%c8, %c0_23] : memref<12x32xf32, #tpu.memory_space<vmem>>, vector<4x16xf32>
    tpu.vector_store %arg6[%c8, %c0_23], %16 {strides = array<i32>} : memref<12x32xf32, #tpu.memory_space<vmem>>, vector<4x16xf32>,
    %c0_24 = arith.constant 0 : index
    %c20 = arith.constant 20 : index
    %18 = vector.load %arg5[%c0_24, %c20] : memref<4x36xf32, #tpu.memory_space<vmem>>, vector<4x16xf32>
    %c8_25 = arith.constant 8 : index
    %c16_26 = arith.constant 16 : index
    %19 = vector.load %arg6[%c8_25, %c16_26] : memref<12x32xf32, #tpu.memory_space<vmem>>, vector<4x16xf32>
    tpu.vector_store %arg6[%c8_25, %c16_26], %18 {strides = array<i32>} : memref<12x32xf32, #tpu.memory_space<vmem>>, vector<4x16xf32>,
    %c0_27 = arith.constant 0 : index
    %c0_28 = arith.constant 0 : index
    %20 = vector.load %arg2[%c0_27, %c0_28] : memref<8x12xf32, #tpu.memory_space<vmem>>, vector<8x12xf32>
    %c0_29 = arith.constant 0 : index
    %c0_30 = arith.constant 0 : index
    %21 = vector.load %arg6[%c0_29, %c0_30] : memref<12x32xf32, #tpu.memory_space<vmem>>, vector<12x32xf32>
    %cst_31 = arith.constant dense<0.000000e+00> : vector<8x32xf32>
    %22 = tpu.matmul %20, %21, %cst_31 {dimension_numbers = #tpu.dot_dimension_numbers<[1], [0], [0], [1], [0, 0, 1, 1], [], []>} : vector<8x12xf32>, vector<12x32xf32>, vector<8x32xf32> -> vector<8x32xf32>
    %c0_32 = arith.constant 0 : index
    %c0_33 = arith.constant 0 : index
    %23 = vector.load %arg3[%c0_32, %c0_33] : memref<8x1xf32, #tpu.memory_space<vmem>>, vector<8x1xf32>
    %24 = vector.broadcast %23 : vector<8x1xf32> to vector<8x32xf32>
    %25 = arith.addf %22, %24 : vector<8x32xf32>
    %26 = vector.extract_strided_slice %25 {offsets = [0, 0], sizes = [8, 16], strides = [1, 1]} : vector<8x32xf32> to vector<8x16xf32>
    %c0_34 = arith.constant 0 : index
    %c0_35 = arith.constant 0 : index
    %c0_36 = arith.constant 0 : index
    %27 = vector.load %arg4[%c0_34, %c0_35, %c0_36] : memref<2x8x16xf32, #tpu.memory_space<vmem>>, vector<1x8x16xf32>
    %28 = vector.shape_cast %27 : vector<1x8x16xf32> to vector<8x16xf32>
    %29 = vector.shape_cast %26 : vector<8x16xf32> to vector<1x8x16xf32>
    tpu.vector_store %arg4[%c0_34, %c0_35, %c0_36], %29 {strides = array<i32>} : memref<2x8x16xf32, #tpu.memory_space<vmem>>, vector<1x8x16xf32>,
    %30 = vector.extract_strided_slice %25 {offsets = [0, 16], sizes = [8, 16], strides = [1, 1]} : vector<8x32xf32> to vector<8x16xf32>
    %c1_37 = arith.constant 1 : index
    %c0_38 = arith.constant 0 : index
    %c0_39 = arith.constant 0 : index
    %31 = vector.load %arg4[%c1_37, %c0_38, %c0_39] : memref<2x8x16xf32, #tpu.memory_space<vmem>>, vector<1x8x16xf32>
    %32 = vector.shape_cast %31 : vector<1x8x16xf32> to vector<8x16xf32>
    %33 = vector.shape_cast %30 : vector<8x16xf32> to vector<1x8x16xf32>
    tpu.vector_store %arg4[%c1_37, %c0_38, %c0_39], %33 {strides = array<i32>} : memref<2x8x16xf32, #tpu.memory_space<vmem>>, vector<1x8x16xf32>,
    return
  }
  func.func @transform_0(%arg0: i32) -> (i32, i32, i32) {
    %c0_i32 = arith.constant 0 : i32
    %c0_i32_0 = arith.constant 0 : i32
    %c0_i32_1 = arith.constant 0 : i32
    return %arg0, %c0_i32, %c0_i32_0 : i32, i32, i32
  }
  func.func @transform_1(%arg0: i32) -> (i32, i32) {
    %c0_i32 = arith.constant 0 : i32
    %c0_i32_0 = arith.constant 0 : i32
    %c0_i32_1 = arith.constant 0 : i32
    return %c0_i32, %c0_i32_0 : i32, i32
  }
  func.func @transform_2(%arg0: i32) -> (i32, i32) {
    %c0_i32 = arith.constant 0 : i32
    %c0_i32_0 = arith.constant 0 : i32
    %c0_i32_1 = arith.constant 0 : i32
    return %c0_i32, %c0_i32_0 : i32, i32
  }
  func.func @transform_3(%arg0: i32) -> (i32, i32, i32) {
    %c0_i32 = arith.constant 0 : i32
    %c0_i32_0 = arith.constant 0 : i32
    %c0_i32_1 = arith.constant 0 : i32
    return %arg0, %c0_i32, %c0_i32_0 : i32, i32, i32
  }
}

</mosaic_0001>

<bundles_post_ra>
// kernel: tpu_custom_call.1
= control target key start
LH: loop header
LB: loop body
LE: loop exit
PB: predicated region body
PF: predicated region fallthrough
CT: control target
= control target key end

     0   :  { %8 = vsyncpa [#allocation5], 0  ;;  %s265_s0 = inlined_call_operand.vmem [shape: f32[2,4,16], index: 0, kind: input, shape index: {}]   ;;  %s266_s1 = inlined_call_operand.hbm [shape: f32[8,12], index: 1, kind: input, shape index: {}]   ;;  %s267_s2 = inlined_call_operand.vmem [shape: f32[8,1], index: 2, kind: input, shape index: {}]   ;;  %s268_s3 = inlined_call_operand.hbm [shape: f32[2,8,16], index: 3, kind: output, shape index: {}]  }
   0x1   :  { %9 = vsyncpa [#allocation6], 0  ;;  %s17_s14 = sshll.u32 %s266_s1, 4  ;;  %s214_s15 = smov [#allocation4]   ;;  %s18_s14 = int_to_ptr.hbm [resolvable:$true] %s17_s14 }
   0x2   :  { %s19_s16 = sshll.u32 %s214_s15, 4  ;;  %s20_s16 = int_to_ptr.vmem [resolvable:$true] %s19_s16 }
   0x3   :  { %22 = dma.hbm_to_vmem [thread:$0]  %s18_s14, 128, %s20_s16, [#allocation5]  }
   0x4   :  { %210 = dma.done.wait [#allocation5], 128  }
   0x5   :  { %211 = vsyncadd [#allocation5], 4294967168  ;;  %vm29_vm0 = vcmask 289792   ;;  %v215_v0 = vmov 0.0   ;;  %v31_v1 = vld [vmem:[%s265_s0] sm:$0xf] }
   0x6   :  { %30 = vst.msk [vmem:[#allocation2] sm:$0xf] %vm29_vm0, %v215_v0  ;;  %s216_s19 = smov 1   ;;  %v144_v2 = vld [vmem:[%s265_s0 + $0x4] sm:$0xf]  ;;  %s217_s1 = smov 19  }
   0x7   :  { %33 = vrot.lane.b32.xlu0 %v31_v1, %s216_s19  ;;  %vm36_vm1 = vcmask 134152   ;;  %vm44_vm2 = vcmask 281752   ;;  %vm47_vm3 = vcmask 125952   ;;  %s218_s22 = smov 126   ;;  %s219_s23 = smov 125   ;;  %vm54_vm4 = vcmask 257152  }
   0x8   :  { %s220_s24 = smov 127   ;;  %s221_s0 = smov 124   ;;  %v83_v13 = vld [vmem:[%s267_s2] sm:$0xff]  ;;  %v222_v14 = vmov 0   ;;  %vm93_vm5 = vcmask 1043456   ;;  %v80_v19 = vld [vmem:[#allocation4] sm:$0xff] }
   0x9   :  { %160 = vset.pattern.permute.xlu1 %v222_v14  ;;  %161 = vset.pattern.permute.xlu0 %v222_v14  ;;  %vm89_vm6 = vcmask 97280   ;;  %vm117_vm7 = vcmask 130048   ;;  %s223_s2 = smov 112   ;;  %s224_s27 = smov [#allocation7]  }
   0xa   :  { %s129_s28 = sshll.u32 %s224_s27, 4  ;;  %s131_s4 = sshll.u32 %s268_s3, 4  ;;  %s130_s28 = int_to_ptr.vmem [resolvable:$true] %s129_s28  ;;  %s132_s4 = int_to_ptr.hbm [resolvable:$true] %s131_s4 }
   0xb   :  { %s225_s5 = smov 128   ;;  %s226_s6 = smov 8  }
   0xf   :  { %41 = vrot.lane.b32.xlu0 %v144_v2, %s217_s1 }
  0x79   :  { %v34_v3 = vpop.permute.xlu0 %33 }
  0x7a   :  { %37 = vst.msk [vmem:[#allocation2] sm:$0xf] %vm36_vm1, %v34_v3 }
  0x81   :  { %v42_v4 = vpop.permute.xlu0 %41 }
  0x82   :  { %45 = vst.msk [vmem:[#allocation2] sm:$0xf] %vm44_vm2, %v42_v4 }
  0x89   :  { %v68_v5 = vld [vmem:[#allocation2] sm:$0xf] }
  0x8a   :  { %v62_v6 = vld [vmem:[#allocation2] sm:$0xf]  ;;  %70 = vrot.lane.b32.xlu1 %v68_v5, %s218_s22 }
  0x8b   :  { %v56_v7 = vld [vmem:[#allocation2] sm:$0xf]  ;;  %64 = vrot.lane.b32.xlu0 %v62_v6, %s219_s23 }
  0x8c   :  { %v46_v8 = vld [vmem:[#allocation2] sm:$0xf]  ;;  %58 = vrot.lane.b32.xlu2 %v56_v7, %s220_s24 }
  0x8d   :  { %48 = vst.msk [vmem:[#allocation3] sm:$0xf] %vm47_vm3, %v46_v8  ;;  %v74_v9 = vld [vmem:[#allocation2] sm:$0xf] }
  0x8e   :  { %v49_v10 = vld [vmem:[#allocation2] sm:$0xf] }
  0x92   :  { %76 = vrot.lane.b32.xlu1 %v74_v9, %s221_s0 }
  0x94   :  { %51 = vrot.lane.b32.xlu2 %v49_v10, %s218_s22 }
  0x9a   :  { %86 = vperm.xlu1 %160, %v83_v13  }
  0xe6   :  { %v59_v11 = vpop.permute.xlu2 %58 }
  0xe7   :  { %61 = vst.msk [vmem:[#allocation3 + $0x4] sm:$0xf] %vm47_vm3, %v59_v11 }
  0xee   :  { %v52_v12 = vpop.permute.xlu2 %51 }
  0xef   :  { %55 = vst.msk [vmem:[#allocation3] sm:$0xf] %vm54_vm4, %v52_v12 }
  0xfc   :  { %v71_v15 = vpop.permute.xlu1 %70 }
  0xfd   :  { %v65_v16 = vpop.permute.xlu0 %64  ;;  %73 = vst.msk [vmem:[#allocation3 + $0x8] sm:$0xf] %vm47_vm3, %v71_v15 }
  0xfe   :  { %67 = vst.msk [vmem:[#allocation3 + $0x4] sm:$0xf] %vm54_vm4, %v65_v16 }
 0x104   :  { %v77_v17 = vpop.permute.xlu1 %76 }
 0x105   :  { %79 = vst.msk [vmem:[#allocation3 + $0x8] sm:$0xf] %vm54_vm4, %v77_v17  ;;  %v81_v20 = vld [vmem:[#allocation3] sm:$0xff] }
 0x10c   :  { %v82_v18 = vld [vmem:[#allocation3 + $0x8] sm:$0xf]  ;;  %v87_v21 = vpop.permute.xlu1 %86 }
 0x10d   :  { %145 = vmatpush.msk.msra.mxu0 %vm93_vm5, %v82_v18 }
 0x10f   :  { %112 = vmatpush.msra.mxu0 %v81_v20 }
 0x110   :  { %146 = vmatmul.msk.f32.vlgmr.msra.gmra.mxu0 %vm89_vm6, %v80_v19 }
 0x18d   :  { %v114_v22 = vpop.f32.mrf.mxu0 }
 0x18e   :  { %v115_v23 = vadd.f32 %v114_v22, %v87_v21 }
 0x190   :  { %120 = vrot.lane.b32.xlu2 %v115_v23, %s223_s2  ;;  %118 = vst.msk [vmem:[#allocation7] sm:$0xff] %vm117_vm7, %v115_v23 }
 0x1ea   :  { %v121_v24 = vpop.permute.xlu2 %120 }
 0x1eb   :  { %124 = vst.msk [vmem:[#allocation7 + $0x8] sm:$0xff] %vm117_vm7, %v121_v24 }
 0x1ec   :  { %137 = dma.vmem_to_hbm [thread:$0]  %s130_s28, 256, %s132_s4, [#allocation6], %s225_s5, %s225_s5, %s226_s6  }
 0x1ed   :  { %212 = dma.done.wait [#allocation6], 256  }
 0x1ee   :  { %213 = vsyncadd [#allocation6], 4294967040 }
 0x1ef   :  { %142 = vsyncpa [#allocation5], 1 }
 0x1f0   :  { %143 = vsyncpa [#allocation6], 1 }

</bundles_post_ra>
